<compile_context>
chip_gen: v7x
topology: tpu7x:2x2x1
jax: 0.10.0
libtpu: 0.0.40
codegen_flags: <defaults>
</compile_context>

<pallas_src>
import math
from functools import partial

import numpy as np
import jax
import jax.numpy as jnp
from jax import lax
from jax.experimental import pallas as pl
from jax.experimental.pallas import tpu as pltpu


# -----------------------------------------------------------------------------
# Pallas kernel: one fused K=3*W*C matmul + bias + LeakyReLU epilogue
# -----------------------------------------------------------------------------
def _conv_rows_lrelu_kernel(l_ref, m_ref, b_ref, o_ref):
    """One (image, output-column-tile) per grid step.

    l_ref: (1, Ho, 3*W*Ci) bf16  ky-concatenated, vertically replicated source rows.
    m_ref: (3*W*Ci, TN)    bf16  K-stacked block-banded weights (horizontal taps,
                                 channel mixing, horizontal upsample+padding folded in).
    b_ref: (1, TN)         f32   bias replicated per output column.
    o_ref: (1, Ho, TN)     f32   conv + bias + LeakyReLU(0.2), lane-dense output tile.
    """
    acc = jnp.dot(l_ref[0], m_ref[...], preferred_element_type=jnp.float32)
    acc = acc + b_ref[...]                                  # broadcast over rows (f32)
    o_ref[0] = jnp.where(acc >= 0, acc, 0.2 * acc).astype(o_ref.dtype)


# -----------------------------------------------------------------------------
# Precomputation (hoisted out of the per-call forward)
# -----------------------------------------------------------------------------
def _stage_scales(upscale_factor):
    if upscale_factor == 3:
        return (3,)
    if upscale_factor >= 2 and (upscale_factor & (upscale_factor - 1)) == 0:
        return (2,) * int(math.log2(upscale_factor) + 1e-8)
    raise NotImplementedError(f"unsupported upscale_factor={upscale_factor}")


def prepare_kernel_params(params, in_hw, upscale_factor):
    """Per-stage (stacked band matrix bf16, bias row f32), computed ONCE with numpy.

    M'_ky[j_in*Ci + ci, j_out*Co + co] = sum_{kx: 0 <= j_out+kx-1 < Wo,
                                               (j_out+kx-1)//s == j_in} w[co, ci, ky, kx]
    i.e. horizontal conv taps, channel mixing, horizontal zero padding AND the horizontal
    nearest upsample are all folded into the weight matrix.  The three ky matrices are
    stacked along K so the kernel does a single matmul.
    """
    scales = _stage_scales(upscale_factor)
    assert len(scales) == len(params)
    h, w = in_hw
    prepared = []
    for (w_pt, b), s in zip(params, scales):
        w_np = np.asarray(w_pt, np.float32)                       # (Co, Ci, 3, 3)
        b_np = np.asarray(b, np.float32)                          # (Co,)
        co, ci, kh, kw = w_np.shape
        wo = s * w
        w_k = np.transpose(w_np, (2, 3, 1, 0))                    # (3, 3, Ci, Co)
        rep = np.kron(np.eye(w, dtype=np.float32),
                      np.ones((1, s), np.float32))                # (W, Wo) column replicate
        mats = []
        for ky in range(kh):
            m = np.zeros((w * ci, wo * co), np.float32)
            for kx in range(kw):
                shift = np.eye(wo, k=-(kx - 1), dtype=np.float32) # jj == j_out + kx - 1
                m += np.kron(rep @ shift, w_k[ky, kx])
            mats.append(m)
        m_stacked = np.concatenate(mats, axis=0)                  # (3*W*Ci, Wo*Co)
        b_row = np.tile(b_np, wo).reshape(1, wo * co)             # (1, Wo*Co)
        prepared.append((jnp.asarray(m_stacked, jnp.bfloat16),
                         jnp.asarray(b_row, jnp.float32)))
        h, w = s * h, s * w
    return tuple(prepared)


# -----------------------------------------------------------------------------
# Per-stage wrapper around pallas_call
# -----------------------------------------------------------------------------
def _pick_col_tile(wc_out):
    if wc_out % 128 != 0:
        return wc_out                       # tiny-channel case: single full-width tile
    for t in (512, 256, 128):
        if wc_out % t == 0:
            return t
    return 128


def _upsample_conv_lrelu_stage(xf, m_stk, b_row, h, w, c, s):
    """nearest-upsample(s) -> conv3x3 'same' -> +bias -> LeakyReLU(0.2).

    xf: (N, H, W*C) f32 flattened lane-dense rows.  Returns ((N, Ho, Wo*C) f32, Ho, Wo).
    """
    n = xf.shape[0]
    ho, wo = s * h, s * w
    k3 = 3 * w * c
    wc_out = wo * c
    assert m_stk.shape == (k3, wc_out), (m_stk.shape, (k3, wc_out))

    # LHS producer: vertical nearest replication + 1-row halo + ky-tap concat, one fused
    # XLA gather over bf16 rows.  Horizontal upsample/padding live inside m_stk.
    idx = np.empty((ho, 3), np.int32)
    for r in range(ho):
        for ky in range(3):
            vv = r + ky - 1                                       # row in upsampled space
            idx[r, ky] = (vv // s) if 0 <= vv < ho else h         # h -> appended zero row
    x_b = xf.astype(jnp.bfloat16)
    x_z = jnp.concatenate([x_b, jnp.zeros((n, 1, w * c), jnp.bfloat16)], axis=1)
    lhs = x_z[:, jnp.asarray(idx)].reshape(n, ho, k3)             # (N, Ho, 3*W*C) bf16

    tn = _pick_col_tile(wc_out)
    n_col = wc_out // tn

    cost = pl.CostEstimate(
        flops=int(2 * n * ho * k3 * wc_out),
        transcendentals=0,
        bytes_accessed=int(lhs.size * 2 + m_stk.size * 2 + b_row.size * 4
                           + n * ho * wc_out * 4))

    y_flat = pl.pallas_call(
        _conv_rows_lrelu_kernel,
        out_shape=jax.ShapeDtypeStruct((n, ho, wc_out), jnp.float32),
        grid_spec=pltpu.PrefetchScalarGridSpec(
            num_scalar_prefetch=0,
            grid=(n, n_col),
            in_specs=[
                pl.BlockSpec((1, ho, k3), lambda i, j: (i, 0, 0)),
                pl.BlockSpec((k3, tn), lambda i, j: (0, j)),
                pl.BlockSpec((1, tn), lambda i, j: (0, j)),
            ],
            out_specs=pl.BlockSpec((1, ho, tn), lambda i, j: (i, 0, j)),
        ),
        compiler_params=pltpu.CompilerParams(
            dimension_semantics=("parallel", "parallel")),
        cost_estimate=cost,
    )(lhs, m_stk, b_row)

    return y_flat, ho, wo


@partial(jax.jit, static_argnums=(2, 3))
def interpolate_upsample_block(x_nchw, kernel_params, upscale_factor=2, mode="nearest"):
    """Forward pass matching PyTorch InterpolateUpsampleBlock.  Layout: NCHW in/out.

    kernel_params: output of prepare_kernel_params (precomputed once, outside jit).
    """
    if mode != "nearest":
        # TODO(synk): bilinear / bicubic interpolation modes not implemented.
        raise NotImplementedError(f"mode={mode}")
    scales = _stage_scales(upscale_factor)
    assert len(scales) == len(kernel_params)
    n, c, h, w = x_nchw.shape
    # NCHW -> flattened lane-dense rows (N, H, W*C), exactly once.
    xf = jnp.transpose(x_nchw.astype(jnp.float32), (0, 2, 3, 1)).reshape(n, h, w * c)
    for (m_stk, b_row), s in zip(kernel_params, scales):
        xf, h, w = _upsample_conv_lrelu_stage(xf, m_stk, b_row, h, w, c, s)
    # flattened rows -> NCHW, exactly once.
    return jnp.transpose(xf.reshape(n, h, w, c), (0, 3, 1, 2))


# -----------------------------------------------------------------------------
# Params + pure-JAX reference
# -----------------------------------------------------------------------------
def init_params(key, channels, upscale_factor=2):
    """Deterministic synthetic per-stage (weight, bias) in PyTorch (Co,Ci,3,3) layout."""
    n_stages = len(_stage_scales(upscale_factor))
    fan_in = channels * 9
    bound = 1.0 / math.sqrt(fan_in)
    params = []
    for _ in range(n_stages):
        key, kw, kb = jax.random.split(key, 3)
        wgt = jax.random.uniform(kw, (channels, channels, 3, 3), jnp.float32, -bound, bound)
        b = jax.random.uniform(kb, (channels,), jnp.float32, -bound, bound)
        params.append((wgt, b))
    return tuple(params)


def _reference(x_nchw, params, upscale_factor=2):
    """Pure-JAX (XLA, f32 HIGHEST precision) reference for correctness checking."""
    x = x_nchw.astype(jnp.float32)
    for (wgt, b), s in zip(params, _stage_scales(upscale_factor)):
        x = jnp.repeat(jnp.repeat(x, s, axis=2), s, axis=3)       # nearest upsample
        y = lax.conv_general_dilated(
            x, wgt, window_strides=(1, 1), padding=((1, 1), (1, 1)),
            dimension_numbers=("NCHW", "OIHW", "NCHW"),
            precision=lax.Precision.HIGHEST)
        y = y + b[None, :, None, None]
        x = jnp.where(y >= 0, y, 0.2 * y)                         # LeakyReLU(0.2)
    return x


if __name__ == "__main__":
    key = jax.random.PRNGKey(0)
    k_x, k_p = jax.random.split(key)

    batch, channels, spatial = 2, 4, 16
    upscale_factor = 2

    x = jax.random.normal(k_x, (batch, channels, spatial, spatial), jnp.float32)
    params = init_params(k_p, channels, upscale_factor)
    kparams = prepare_kernel_params(params, (spatial, spatial), upscale_factor)

    out = interpolate_upsample_block(x, kparams, upscale_factor, "nearest")
    out = jax.block_until_ready(out)
    assert out.shape == (batch, channels, spatial * upscale_factor,
                         spatial * upscale_factor), out.shape

    ref = jax.block_until_ready(_reference(x, params, upscale_factor))
    max_err = float(jnp.max(jnp.abs(out - ref)))
    # bf16 matmul operands with f32 accumulation vs an f32 HIGHEST-precision reference.
    assert jnp.allclose(out, ref, atol=1e-2, rtol=1e-2), f"max_err={max_err}"

    print("KERNEL_OK")
</pallas_src>

<mosaic_0001>
module attributes {stable_mosaic.version = 11 : i64} {
  func.func @_conv_rows_lrelu_kernel(%arg0: i32, %arg1: i32, %arg2: memref<1x32x192xbf16, #tpu.memory_space<vmem>>, %arg3: memref<192x128xbf16, #tpu.memory_space<vmem>>, %arg4: memref<1x128xf32, #tpu.memory_space<vmem>>, %arg5: memref<1x32x128xf32, #tpu.memory_space<vmem>>) attributes {dimension_semantics = [#tpu.dimension_semantics<parallel>, #tpu.dimension_semantics<parallel>], iteration_bounds = array<i64: 2, 1>, scalar_prefetch = 0 : i64, scratch_operands = 0 : i64, tpu.core_type = #tpu.core_type<tc>, window_params = [{transform_indices = @transform_0, window_bounds = array<i64: 1, 32, 192>}, {transform_indices = @transform_1, window_bounds = array<i64: 192, 128>}, {transform_indices = @transform_2, window_bounds = array<i64: 1, 128>}, {transform_indices = @transform_3, window_bounds = array<i64: 1, 32, 128>}]} {
    %c0 = arith.constant 0 : index
    %c0_0 = arith.constant 0 : index
    %c0_1 = arith.constant 0 : index
    %0 = vector.load %arg2[%c0, %c0_0, %c0_1] : memref<1x32x192xbf16, #tpu.memory_space<vmem>>, vector<1x32x192xbf16>
    %1 = vector.shape_cast %0 : vector<1x32x192xbf16> to vector<32x192xbf16>
    %c0_2 = arith.constant 0 : index
    %c0_3 = arith.constant 0 : index
    %2 = vector.load %arg3[%c0_2, %c0_3] : memref<192x128xbf16, #tpu.memory_space<vmem>>, vector<192x128xbf16>
    %cst = arith.constant dense<0.000000e+00> : vector<32x128xf32>
    %3 = tpu.matmul %1, %2, %cst {dimension_numbers = #tpu.dot_dimension_numbers<[1], [0], [0], [1], [0, 0, 1, 1], [], []>} : vector<32x192xbf16>, vector<192x128xbf16>, vector<32x128xf32> -> vector<32x128xf32>
    %c0_4 = arith.constant 0 : index
    %c0_5 = arith.constant 0 : index
    %4 = vector.load %arg4[%c0_4, %c0_5] : memref<1x128xf32, #tpu.memory_space<vmem>>, vector<1x128xf32>
    %5 = vector.broadcast %4 : vector<1x128xf32> to vector<32x128xf32>
    %6 = arith.addf %3, %5 : vector<32x128xf32>
    %cst_6 = arith.constant 0.000000e+00 : f32
    %7 = vector.broadcast %cst_6 : f32 to vector<32x128xf32>
    %8 = arith.cmpf oge, %6, %7 : vector<32x128xf32>
    %cst_7 = arith.constant 2.000000e-01 : f32
    %9 = vector.broadcast %cst_7 : f32 to vector<32x128xf32>
    %10 = arith.mulf %9, %6 : vector<32x128xf32>
    %11 = arith.select %8, %6, %10 : vector<32x128xi1>, vector<32x128xf32>
    %c0_8 = arith.constant 0 : index
    %c0_9 = arith.constant 0 : index
    %c0_10 = arith.constant 0 : index
    %12 = vector.load %arg5[%c0_8, %c0_9, %c0_10] : memref<1x32x128xf32, #tpu.memory_space<vmem>>, vector<1x32x128xf32>
    %13 = vector.shape_cast %12 : vector<1x32x128xf32> to vector<32x128xf32>
    %14 = vector.shape_cast %11 : vector<32x128xf32> to vector<1x32x128xf32>
    tpu.vector_store %arg5[%c0_8, %c0_9, %c0_10], %14 {strides = array<i32>} : memref<1x32x128xf32, #tpu.memory_space<vmem>>, vector<1x32x128xf32>,
    return
  }
  func.func @transform_0(%arg0: i32, %arg1: i32) -> (i32, i32, i32) {
    %c0_i32 = arith.constant 0 : i32
    %c0_i32_0 = arith.constant 0 : i32
    %c0_i32_1 = arith.constant 0 : i32
    return %arg0, %c0_i32, %c0_i32_0 : i32, i32, i32
  }
  func.func @transform_1(%arg0: i32, %arg1: i32) -> (i32, i32) {
    %c0_i32 = arith.constant 0 : i32
    %c0_i32_0 = arith.constant 0 : i32
    return %c0_i32, %arg1 : i32, i32
  }
  func.func @transform_2(%arg0: i32, %arg1: i32) -> (i32, i32) {
    %c0_i32 = arith.constant 0 : i32
    %c0_i32_0 = arith.constant 0 : i32
    return %c0_i32, %arg1 : i32, i32
  }
  func.func @transform_3(%arg0: i32, %arg1: i32) -> (i32, i32, i32) {
    %c0_i32 = arith.constant 0 : i32
    %c0_i32_0 = arith.constant 0 : i32
    return %arg0, %c0_i32, %arg1 : i32, i32, i32
  }
}

</mosaic_0001>

<bundles_post_ra>
// kernel: interpolate_upsample_block.1
= control target key start
LH: loop header
LB: loop body
LE: loop exit
PB: predicated region body
PF: predicated region fallthrough
CT: control target
= control target key end

     0   :  { %s671_s12 = smov 0   ;;  %s673_s13 = smov 0   ;;  %s780_s0 = inlined_call_operand.vmem [shape: bf16[2,32,192], index: 0, kind: input, shape index: {}]   ;;  %s781_s1 = inlined_call_operand.vmem [shape: bf16[192,128], index: 1, kind: input, shape index: {}]   ;;  %s782_s2 = inlined_call_operand.vmem [shape: f32[1,128], index: 2, kind: input, shape index: {}]   ;;  %s783_s3 = inlined_call_operand.vmem [shape: f32[2,32,128], index: 3, kind: output, shape index: {}]  }
   0x1   :  { %s675_s14 = smov 0  }
   0x2 LB: > { %s25_s15 = sadd.s32 1, %s644_s13  ;;  %p531_p0 = scmp.ge.s32.totalorder %s648_s14, 1  ;;  %s648_s14 = sphi %s675_s14, %s13_s14   ;;  %s644_s13 = sphi %s673_s13, %s785_s13   ;;  %s640_s12 = sphi %s671_s12, %s784_s12  }
   0x3   : > { %p27_p1 = scmp.ge.s32.totalorder %s25_s15, 2  ;;  %p168_p2 = scmp.lt.s32.totalorder %s648_s14, 3 }
   0x5   : > { %s787_s15 = smov (%p27_p1, %s25_s15), 0  ;;  %p169_p3 = pnand %p531_p0, %p168_p2 }
   0x6   : > { %v608_v0 = vld [vmem:[%s781_s1] sm:$0xff] (!%p169_p3)   ;;  %v650_v1 = vmov (!%p169_p3), 0   ;;  %p202_p4 = scmp.lt.s32.totalorder (!%p169_p3), %s640_s12, 1  ;;  %v609_v2 = vld [vmem:[%s781_s1 + $0x8] sm:$0xff] (!%p169_p3)   ;;  %v610_v3 = vld [vmem:[%s781_s1 + $0x10] sm:$0xff] (!%p169_p3)   ;;  %vm348_vm0 = vcmask (!%p169_p3), 523264  }
   0x7   : > { %172 = sbr.rel (%p169_p3) target bundleno = 277 (0x115), region = 32  ;;  %355 = vmatprep.subr.bf16.mxu0 (!%p169_p3), %v650_v1  ;;  %559 = vmatprep.subr.bf16.mxu1 (!%p169_p3), %v650_v1  ;;  %v611_v4 = vld [vmem:[%s781_s1 + $0x18] sm:$0xff] (!%p169_p3)   ;;  %v612_v6 = vld [vmem:[%s781_s1 + $0x20] sm:$0xff] (!%p169_p3)   ;;  %v613_v8 = vld [vmem:[%s781_s1 + $0x28] sm:$0xff] (!%p169_p3)  }
   0x8   : > { %356 = vmatpush1.bf16.msra.mxu0 (!%p169_p3), %v608_v0  ;;  %571 = vmatpush1.bf16.msra.mxu1 (!%p169_p3), %v608_v0  ;;  %v614_v9 = vld [vmem:[%s781_s1 + $0x30] sm:$0xff] (!%p169_p3)   ;;  %v615_v10 = vld [vmem:[%s781_s1 + $0x38] sm:$0xff] (!%p169_p3)   ;;  %v616_v11 = vld [vmem:[%s781_s1 + $0x40] sm:$0xff] (!%p169_p3)  }
   0x9   : > { %357 = vmatprep.subr.bf16.mxu0 (!%p169_p3), %v650_v1  ;;  %560 = vmatprep.subr.bf16.mxu1 (!%p169_p3), %v650_v1  ;;  %v617_v12 = vld [vmem:[%s781_s1 + $0x48] sm:$0xff] (!%p169_p3)   ;;  %v618_v13 = vld [vmem:[%s781_s1 + $0x50] sm:$0xff] (!%p169_p3)   ;;  %v619_v14 = vld [vmem:[%s781_s1 + $0x58] sm:$0xff] (!%p169_p3)  }
   0xa   : > { %v536_v17 = vld [vmem:[%s782_s2] ss:$0 sm:$0xff] (!%p169_p3) }
   0xc   : > { %358 = vmatpush1.bf16.msra.mxu0 (!%p169_p3), %v609_v2  ;;  %572 = vmatpush1.bf16.msra.mxu1 (!%p169_p3), %v609_v2 }
   0xd   : > { %359 = vmatprep.subr.bf16.mxu0 (!%p169_p3), %v650_v1  ;;  %561 = vmatprep.subr.bf16.mxu1 (!%p169_p3), %v650_v1 }
   0xe   : > { %s789_s12 = smov (!%p202_p4, %s640_s12), 1 }
   0xf   : > { %s557_s22 = sshll.u32 %s789_s12, 5 }
  0x10   : > { %360 = vmatpush1.bf16.msra.mxu0 %v610_v3  ;;  %573 = vmatpush1.bf16.msra.mxu1 %v610_v3  ;;  %s715_s27 = scalar_lea.vmem %s780_s0, %s557_s22  ;;  %s221_s26 = scalar_lea.vmem %s783_s3, %s557_s22 }
  0x11   : > { %361 = vmatprep.subr.bf16.mxu0 %v650_v1  ;;  %562 = vmatprep.subr.bf16.mxu1 %v650_v1  ;;  %v622_v5 = vld [vmem:[%s715_s27 + $0x4] ss:$8 sps:$4 sm:$0xff]   ;;  %v625_v7 = vld [vmem:[%s715_s27 + $0x14] ss:$8 sps:$4 sm:$0xff]   ;;  %v620_v15 = vld [vmem:[%s715_s27] ss:$8 sps:$4 sm:$0xff]  }
  0x12   : > { %553 = vmatprep.mubr.msk.bf16.mxu0 %vm348_vm0, %v622_v5  ;;  %554 = vmatprep.mubr.msk.bf16.mxu1 %vm348_vm0, %v625_v7  ;;  %v623_v16 = vld [vmem:[%s715_s27 + $0x10] ss:$8 sps:$4 sm:$0xff]  }
  0x14   : > { %362 = vmatpush1.bf16.msra.mxu0 %v611_v4  ;;  %574 = vmatpush1.bf16.msra.mxu1 %v611_v4 }
  0x15   : > { %363 = vmatprep.subr.bf16.mxu0 %v650_v1  ;;  %563 = vmatprep.subr.bf16.mxu1 %v650_v1 }
  0x18   : > { %364 = vmatpush1.bf16.msra.mxu0 %v612_v6  ;;  %575 = vmatpush1.bf16.msra.mxu1 %v612_v6 }
  0x19   : > { %365 = vmatprep.subr.bf16.mxu0 %v650_v1  ;;  %564 = vmatprep.subr.bf16.mxu1 %v650_v1 }
  0x1c   : > { %366 = vmatpush1.bf16.msra.mxu0 %v613_v8  ;;  %576 = vmatpush1.bf16.msra.mxu1 %v613_v8 }
  0x1d   : > { %367 = vmatprep.subr.bf16.mxu0 %v650_v1  ;;  %565 = vmatprep.subr.bf16.mxu1 %v650_v1 }
  0x20   : > { %368 = vmatpush1.bf16.msra.mxu0 %v614_v9  ;;  %577 = vmatpush1.bf16.msra.mxu1 %v614_v9 }
  0x21   : > { %369 = vmatprep.subr.bf16.mxu0 %v650_v1  ;;  %566 = vmatprep.subr.bf16.mxu1 %v650_v1 }
  0x24   : > { %370 = vmatpush1.bf16.msra.mxu0 %v615_v10  ;;  %578 = vmatpush1.bf16.msra.mxu1 %v615_v10 }
  0x25   : > { %371 = vmatprep.subr.bf16.mxu0 %v650_v1  ;;  %567 = vmatprep.subr.bf16.mxu1 %v650_v1 }
  0x28   : > { %372 = vmatpush1.bf16.msra.mxu0 %v616_v11  ;;  %579 = vmatpush1.bf16.msra.mxu1 %v616_v11 }
  0x29   : > { %373 = vmatprep.subr.bf16.mxu0 %v650_v1  ;;  %568 = vmatprep.subr.bf16.mxu1 %v650_v1 }
  0x2c   : > { %374 = vmatpush1.bf16.msra.mxu0 %v617_v12  ;;  %580 = vmatpush1.bf16.msra.mxu1 %v617_v12 }
  0x2d   : > { %375 = vmatprep.subr.bf16.mxu0 %v650_v1  ;;  %569 = vmatprep.subr.bf16.mxu1 %v650_v1 }
  0x30   : > { %376 = vmatpush1.bf16.msra.mxu0 %v618_v13  ;;  %581 = vmatpush1.bf16.msra.mxu1 %v618_v13 }
  0x31   : > { %377 = vmatprep.subr.bf16.mxu0 %v650_v1  ;;  %570 = vmatprep.subr.bf16.mxu1 %v650_v1 }
  0x34   : > { %378 = vmatpush1.bf16.msra.mxu0 %v619_v14  ;;  %582 = vmatpush1.bf16.msra.mxu1 %v619_v14 }
  0x37   : > { %388 = vmatmul.mubr.bf16.vlgmr.msra.gmra.mrb[0].mxu0 %v620_v15  ;;  %396 = vmatmul.mubr.bf16.vlgmr.msra.gmra.mrb[0].mxu1 %v623_v16 }
 0x10a   : > { %v389_v18 = vpop.f32.mrb[0].mxu0  ;;  %v397_v19 = vpop.f32.mrb[0].mxu1 }
 0x10b   : > { %v390_v20 = vadd.f32 %v536_v17, %v389_v18  ;;  %v398_v21 = vadd.f32 %v536_v17, %v397_v19  ;;  %v391_v22 = vpop.f32.mrb[1].mxu0  ;;  %v399_v23 = vpop.f32.mrb[1].mxu1 }
 0x10c   : > { %v392_v24 = vpop.f32.mrb[2].mxu0  ;;  %v400_v25 = vpop.f32.mrb[2].mxu1 }
 0x10d   : > { %vm404_vm1 = vcmp.ge.f32.partialorder %v390_v20, 0.0  ;;  %v408_v26 = vmul.f32 0.2, %v390_v20  ;;  %vm406_vm2 = vcmp.ge.f32.partialorder %v398_v21, 0.0  ;;  %v410_v27 = vmul.f32 0.2, %v398_v21 }
 0x10e   : > { %v393_v28 = vadd.f32 %v536_v17, %v392_v24  ;;  %v401_v29 = vadd.f32 %v536_v17, %v400_v25  ;;  %v394_v30 = vpop.f32.mrb[3].mxu0  ;;  %v402_v31 = vpop.f32.mrb[3].mxu1 }
 0x10f   : > { %v412_v32 = vsel %vm404_vm1, %v390_v20, %v408_v26  ;;  %v414_v33 = vsel %vm406_vm2, %v398_v21, %v410_v27 }
 0x110   : > { %416 = vst [vmem:[%s221_s26] sm:$0xff] %v412_v32  ;;  %418 = vst [vmem:[%s221_s26 + $0x10] sm:$0xff] %v414_v33  ;;  %vm405_vm3 = vcmp.ge.f32.partialorder %v393_v28, 0.0  ;;  %v409_v34 = vmul.f32 0.2, %v393_v28  ;;  %vm407_vm4 = vcmp.ge.f32.partialorder %v401_v29, 0.0 }
 0x111   : > { %v411_v35 = vmul.f32 0.2, %v401_v29 }
 0x112   : > { %v413_v36 = vsel %vm405_vm3, %v393_v28, %v409_v34 }
 0x113   : > { %v415_v37 = vsel %vm407_vm4, %v401_v29, %v411_v35  ;;  %417 = vst [vmem:[%s221_s26 + $0x8] sm:$0xff] %v413_v36 }
 0x114   : > { %419 = vst [vmem:[%s221_s26 + $0x18] sm:$0xff] %v415_v37 }
 0x115 PF: > { %s13_s14 = sadd.s32 1, %s648_s14   ;;  %s784_s12 = smov %s644_s13 }
 0x116   : > { %p10_p5 = scmp.ge.s32.totalorder %s13_s14, 4   ;;  %s785_s13 = smov %s787_s15 }
 0x118   :  { %12 = sbr.rel (!%p10_p5) target bundleno = 2 (0x2), region = 68 }

</bundles_post_ra>
